<compile_context>
chip_gen: v7x
topology: tpu7x:2x2x1
jax: 0.10.0
libtpu: 0.0.40
codegen_flags: <defaults>
</compile_context>

<pallas_src>
import functools
import math

import jax
import jax.numpy as jnp
from jax import lax
from jax.experimental import pallas as pl
from jax.experimental.pallas import tpu as pltpu


def _round_up(x, m):
    return ((x + m - 1) // m) * m


def _pick_vmem_limit_bytes():
    """~75% of physical VMEM: 96 MiB on v5e/v6e (128 MiB), 48 MiB on v7x (64 MiB)."""
    try:
        cap = int(pltpu.get_tpu_info().vmem_capacity_bytes)
    except Exception:
        cap = 64 * 1024 * 1024  # conservative fallback (v7x-sized)
    return min((cap * 3) // 4, 112 * 1024 * 1024)


def _mlp_kernel(x_ref, w1_ref, b1_ref, w2_ref, b2_ref, o_ref, acc_ref,
                *, th, gelu_approx):
    """One (tm, th) step of  y = GELU(x @ W1 + b1) @ W2 + b2.

    Grid = (M/tm, H/th); axis 1 (last) is the hidden-dim reduction: partial
    products accumulate into acc_ref (f32 VMEM scratch) and the output tile is
    written once (with b2) on the final hidden step.
    """
    k = pl.program_id(1)

    @pl.when(k == 0)
    def _init():
        acc_ref[...] = jnp.zeros_like(acc_ref)

    # Cast the x tile to the MXU compute dtype in-kernel (no extra wrapper
    # pass over x; the VPU cast hides under the matmul).
    xl = x_ref[...].astype(w1_ref.dtype)

    # First linear on a hidden slice: (tm, D) @ (D, th) -> (tm, th), f32 acc.
    h = jnp.dot(xl, w1_ref[...], preferred_element_type=jnp.float32)

    # b1 is fully resident; slice the current hidden chunk (lane-aligned).
    off = pl.multiple_of(k * th, 128)
    h = h + b1_ref[:, pl.ds(off, th)]

    if gelu_approx:
        # tanh approximation: single EUP op, preferred on v6e/v7x where the
        # exact-erf VALU polynomial can saturate the vector-ALU slot.
        c = jnp.float32(0.7978845608028654)  # sqrt(2/pi)
        h = 0.5 * h * (1.0 + jnp.tanh(c * (h + jnp.float32(0.044715) * h * h * h)))
    else:
        # Exact (erf) GELU -- matches torch.nn.GELU() default.
        h = 0.5 * h * (1.0 + lax.erf(h * jnp.float32(1.0 / math.sqrt(2.0))))

    # Second linear partial product: (tm, th) @ (th, D) -> (tm, D); accumulate.
    acc_ref[...] += jnp.dot(
        h.astype(w2_ref.dtype), w2_ref[...], preferred_element_type=jnp.float32
    )

    @pl.when(k == pl.num_programs(1) - 1)
    def _finalize():
        o_ref[...] = (acc_ref[...] + b2_ref[...]).astype(o_ref.dtype)


def pad_mlp_params(w1, b1, w2, b2, *, compute_dtype=jnp.bfloat16):
    """Pad/cast MLP weights once at init time (hoisted out of the call path).

    w1: (D, H); b1: (H,); w2: (H, D); b2: (D,)  -- (in, out) layout, i.e. the
    transpose of torch.nn.Linear.weight. compute_dtype is what the MXU sees
    (bf16 recommended on all generations); accumulation stays f32.
    """
    D, H = w1.shape
    D_pad = _round_up(D, 128)
    H_pad = _round_up(H, 128)
    w1p = jnp.pad(w1, ((0, D_pad - D), (0, H_pad - H))).astype(compute_dtype)
    w2p = jnp.pad(w2, ((0, H_pad - H), (0, D_pad - D))).astype(compute_dtype)
    # Biases stay f32: they are added onto f32 accumulations.
    b1p = jnp.pad(b1, (0, H_pad - H)).astype(jnp.float32).reshape(1, H_pad)
    b2p = jnp.pad(b2, (0, D_pad - D)).astype(jnp.float32).reshape(1, D_pad)
    return dict(w1=w1p, b1=b1p, w2=w2p, b2=b2p, dim=D, hidden_dim=H)


def mlp_block(x, params, *, tm=1024, th=1024, gelu_approx=False):
    """ViT MLP forward: y = GELU(x @ W1 + b1) @ W2 + b2.

    x: (B, S, D); params: output of pad_mlp_params.
    """
    B, S, D_in = x.shape
    D = params["dim"]
    assert D_in == D, "x feature dim does not match the MLP dim"
    w1p, b1p, w2p, b2p = params["w1"], params["b1"], params["w2"], params["b2"]
    D_pad, H_pad = w1p.shape
    M = B * S
    out_dtype = x.dtype

    # Hidden tile: a multiple of 128 that divides H_pad (defaults to 1024).
    th = max(128, min(th, H_pad))
    th = (th // 128) * 128
    while H_pad % th:
        th -= 128

    # Row tile: round small problems up to an MXU-native multiple of 256; for
    # large M keep the default (big tile -> weights streamed few times).
    tm = min(tm, _round_up(M, 256))
    # v7x megacore: keep >= 2 row tiles when there is enough work so both
    # TensorCores get a share of the "parallel" axis.
    if M > 512 and _round_up(M, tm) // tm < 2:
        tm = _round_up((M + 1) // 2, 256)
    M_pad = _round_up(M, tm)

    x2d = x.reshape(M, D)
    if M_pad != M or D_pad != D:
        x2d = jnp.pad(x2d, ((0, M_pad - M), (0, D_pad - D)))
    # NOTE: x keeps its own dtype here; the kernel casts the tile to the MXU
    # compute dtype (w1p.dtype), avoiding a separate XLA cast pass over x.

    grid = (M_pad // tm, H_pad // th)
    n_row_tiles = grid[0]

    w_itemsize = jnp.dtype(w1p.dtype).itemsize
    cost = pl.CostEstimate(
        flops=4 * M_pad * D_pad * H_pad,            # two matmuls
        transcendentals=M_pad * H_pad,              # erf/tanh per hidden elem
        bytes_accessed=(
            x2d.size * jnp.dtype(x2d.dtype).itemsize
            + (w1p.size + w2p.size) * w_itemsize * n_row_tiles  # re-streamed per row tile
            + (b1p.size + b2p.size) * 4
            + M_pad * D_pad * jnp.dtype(out_dtype).itemsize
        ),
    )

    kernel = functools.partial(_mlp_kernel, th=th, gelu_approx=gelu_approx)

    out2d = pl.pallas_call(
        kernel,
        out_shape=jax.ShapeDtypeStruct((M_pad, D_pad), out_dtype),
        grid_spec=pltpu.PrefetchScalarGridSpec(
            num_scalar_prefetch=0,
            grid=grid,
            in_specs=[
                pl.BlockSpec((tm, D_pad), lambda i, k: (i, 0)),   # x row tile
                pl.BlockSpec((D_pad, th), lambda i, k: (0, k)),   # W1 hidden slice
                pl.BlockSpec((1, H_pad), lambda i, k: (0, 0)),    # b1 (resident)
                pl.BlockSpec((th, D_pad), lambda i, k: (k, 0)),   # W2 hidden slice
                pl.BlockSpec((1, D_pad), lambda i, k: (0, 0)),    # b2 (resident)
            ],
            out_specs=pl.BlockSpec((tm, D_pad), lambda i, k: (i, 0)),
            scratch_shapes=[pltpu.VMEM((tm, D_pad), jnp.float32)],
        ),
        compiler_params=pltpu.CompilerParams(
            # Row tiles independent -> megacore-shardable; hidden axis is the
            # reduction (last in grid).
            dimension_semantics=("parallel", "arbitrary"),
            vmem_limit_bytes=_pick_vmem_limit_bytes(),
        ),
        cost_estimate=cost,
    )(x2d, w1p, b1p, w2p, b2p)

    return out2d[:M, :D].reshape(B, S, D)


def _reference_mlp(x, w1, b1, w2, b2):
    h = jnp.einsum("bsd,dh->bsh", x, w1) + b1
    h = 0.5 * h * (1.0 + lax.erf(h / jnp.sqrt(2.0)))
    return jnp.einsum("bsh,hd->bsd", h, w2) + b2


if __name__ == "__main__":
    # Small shapes consistent with the module: (batch, seq, dim) tokens.
    B, S, D, H = 2, 8, 32, 64

    key = jax.random.PRNGKey(0)
    kx, kw1, kb1, kw2, kb2 = jax.random.split(key, 5)

    x = jax.random.normal(kx, (B, S, D), dtype=jnp.float32)

    # Deterministic init mimicking nn.Linear's uniform(-1/sqrt(fan_in), ...)
    lim1 = 1.0 / math.sqrt(D)
    lim2 = 1.0 / math.sqrt(H)
    w1 = jax.random.uniform(kw1, (D, H), minval=-lim1, maxval=lim1, dtype=jnp.float32)
    b1 = jax.random.uniform(kb1, (H,), minval=-lim1, maxval=lim1, dtype=jnp.float32)
    w2 = jax.random.uniform(kw2, (H, D), minval=-lim2, maxval=lim2, dtype=jnp.float32)
    b2 = jax.random.uniform(kb2, (D,), minval=-lim2, maxval=lim2, dtype=jnp.float32)

    ref = _reference_mlp(x, w1, b1, w2, b2)

    # Exact path (f32 MXU operands, erf GELU): tight check vs reference.
    params_f32 = pad_mlp_params(w1, b1, w2, b2, compute_dtype=jnp.float32)
    out = jax.block_until_ready(mlp_block(x, params_f32, gelu_approx=False))
    assert out.shape == (B, S, D)
    assert jnp.allclose(out, ref, atol=1e-5, rtol=1e-5), "f32 mismatch vs reference"

    # Fast path (bf16 MXU operands by default, tanh GELU on EUP): loose check.
    params_fast = pad_mlp_params(w1, b1, w2, b2)  # compute_dtype defaults to bf16
    out_fast = jax.block_until_ready(mlp_block(x, params_fast, gelu_approx=True))
    assert out_fast.shape == (B, S, D)
    assert jnp.allclose(out_fast, ref, atol=8e-2, rtol=5e-2), "bf16 mismatch vs reference"

    print("KERNEL_OK")
</pallas_src>

<mosaic_0001>
module attributes {stable_mosaic.version = 11 : i64} {
  func.func @_mlp_kernel(%arg0: i32, %arg1: i32, %arg2: memref<256x128xf32, #tpu.memory_space<vmem>>, %arg3: memref<128x128xf32, #tpu.memory_space<vmem>>, %arg4: memref<1x128xf32, #tpu.memory_space<vmem>>, %arg5: memref<128x128xf32, #tpu.memory_space<vmem>>, %arg6: memref<1x128xf32, #tpu.memory_space<vmem>>, %arg7: memref<256x128xf32, #tpu.memory_space<vmem>>, %arg8: memref<256x128xf32, #tpu.memory_space<vmem>>) attributes {dimension_semantics = [#tpu.dimension_semantics<parallel>, #tpu.dimension_semantics<arbitrary>], iteration_bounds = array<i64: 1, 1>, scalar_prefetch = 0 : i64, scratch_operands = 1 : i64, tpu.core_type = #tpu.core_type<tc>, window_params = [{transform_indices = @transform_0, window_bounds = array<i64: 256, 128>}, {transform_indices = @transform_1, window_bounds = array<i64: 128, 128>}, {pipeline_mode = #tpu.pipeline_mode<synchronous>, transform_indices = @transform_2, window_bounds = array<i64: 1, 128>}, {transform_indices = @transform_3, window_bounds = array<i64: 128, 128>}, {pipeline_mode = #tpu.pipeline_mode<synchronous>, transform_indices = @transform_4, window_bounds = array<i64: 1, 128>}, {transform_indices = @transform_5, window_bounds = array<i64: 256, 128>}]} {
    %c0_i32 = arith.constant 0 : i32
    %0 = arith.cmpi eq, %arg1, %c0_i32 : i32
    %1 = arith.extui %0 : i1 to i32
    %c0_i32_0 = arith.constant 0 : i32
    %2 = arith.cmpi ne, %1, %c0_i32_0 : i32
    scf.if %2 {
      %cst_17 = arith.constant 0.000000e+00 : f32
      %28 = vector.broadcast %cst_17 : f32 to vector<256x128xf32>
      %c0_18 = arith.constant 0 : index
      %c0_19 = arith.constant 0 : index
      %29 = vector.load %arg8[%c0_18, %c0_19] : memref<256x128xf32, #tpu.memory_space<vmem>>, vector<256x128xf32>
      tpu.vector_store %arg8[%c0_18, %c0_19], %28 {strides = array<i32>} : memref<256x128xf32, #tpu.memory_space<vmem>>, vector<256x128xf32>,
    } else {
    }
    %c0 = arith.constant 0 : index
    %c0_1 = arith.constant 0 : index
    %3 = vector.load %arg2[%c0, %c0_1] : memref<256x128xf32, #tpu.memory_space<vmem>>, vector<256x128xf32>
    %c0_2 = arith.constant 0 : index
    %c0_3 = arith.constant 0 : index
    %4 = vector.load %arg3[%c0_2, %c0_3] : memref<128x128xf32, #tpu.memory_space<vmem>>, vector<128x128xf32>
    %cst = arith.constant dense<0.000000e+00> : vector<256x128xf32>
    %5 = tpu.matmul %3, %4, %cst {dimension_numbers = #tpu.dot_dimension_numbers<[1], [0], [0], [1], [0, 0, 1, 1], [], []>} : vector<256x128xf32>, vector<128x128xf32>, vector<256x128xf32> -> vector<256x128xf32>
    %c128_i32 = arith.constant 128 : i32
    %6 = arith.muli %arg1, %c128_i32 : i32
    %7 = tpu.assume_multiple %6, 128 : i32
    %c0_4 = arith.constant 0 : index
    %8 = arith.index_cast %7 : i32 to index
    %9 = vector.load %arg4[%c0_4, %8] : memref<1x128xf32, #tpu.memory_space<vmem>>, vector<1x128xf32>
    %10 = vector.broadcast %9 : vector<1x128xf32> to vector<256x128xf32>
    %11 = arith.addf %5, %10 : vector<256x128xf32>
    %cst_5 = arith.constant 5.000000e-01 : f32
    %12 = vector.broadcast %cst_5 : f32 to vector<256x128xf32>
    %13 = arith.mulf %12, %11 : vector<256x128xf32>
    %cst_6 = arith.constant 0.707106769 : f32
    %14 = vector.broadcast %cst_6 : f32 to vector<256x128xf32>
    %15 = arith.mulf %11, %14 : vector<256x128xf32>
    %16 = math.erf %15 : vector<256x128xf32>
    %cst_7 = arith.constant 1.000000e+00 : f32
    %17 = vector.broadcast %cst_7 : f32 to vector<256x128xf32>
    %18 = arith.addf %17, %16 : vector<256x128xf32>
    %19 = arith.mulf %13, %18 : vector<256x128xf32>
    %c0_8 = arith.constant 0 : index
    %c0_9 = arith.constant 0 : index
    %20 = vector.load %arg8[%c0_8, %c0_9] : memref<256x128xf32, #tpu.memory_space<vmem>>, vector<256x128xf32>
    %c0_10 = arith.constant 0 : index
    %c0_11 = arith.constant 0 : index
    %21 = vector.load %arg5[%c0_10, %c0_11] : memref<128x128xf32, #tpu.memory_space<vmem>>, vector<128x128xf32>
    %cst_12 = arith.constant dense<0.000000e+00> : vector<256x128xf32>
    %22 = tpu.matmul %19, %21, %cst_12 {dimension_numbers = #tpu.dot_dimension_numbers<[1], [0], [0], [1], [0, 0, 1, 1], [], []>} : vector<256x128xf32>, vector<128x128xf32>, vector<256x128xf32> -> vector<256x128xf32>
    %23 = arith.addf %20, %22 : vector<256x128xf32>
    %c0_13 = arith.constant 0 : index
    %c0_14 = arith.constant 0 : index
    %24 = vector.load %arg8[%c0_13, %c0_14] : memref<256x128xf32, #tpu.memory_space<vmem>>, vector<256x128xf32>
    tpu.vector_store %arg8[%c0_13, %c0_14], %23 {strides = array<i32>} : memref<256x128xf32, #tpu.memory_space<vmem>>, vector<256x128xf32>,
    %c0_i32_15 = arith.constant 0 : i32
    %25 = arith.cmpi eq, %arg1, %c0_i32_15 : i32
    %26 = arith.extui %25 : i1 to i32
    %c0_i32_16 = arith.constant 0 : i32
    %27 = arith.cmpi ne, %26, %c0_i32_16 : i32
    scf.if %27 {
      %c0_17 = arith.constant 0 : index
      %c0_18 = arith.constant 0 : index
      %28 = vector.load %arg8[%c0_17, %c0_18] : memref<256x128xf32, #tpu.memory_space<vmem>>, vector<256x128xf32>
      %c0_19 = arith.constant 0 : index
      %c0_20 = arith.constant 0 : index
      %29 = vector.load %arg6[%c0_19, %c0_20] : memref<1x128xf32, #tpu.memory_space<vmem>>, vector<1x128xf32>
      %30 = vector.broadcast %29 : vector<1x128xf32> to vector<256x128xf32>
      %31 = arith.addf %28, %30 : vector<256x128xf32>
      %c0_21 = arith.constant 0 : index
      %c0_22 = arith.constant 0 : index
      %32 = vector.load %arg7[%c0_21, %c0_22] : memref<256x128xf32, #tpu.memory_space<vmem>>, vector<256x128xf32>
      tpu.vector_store %arg7[%c0_21, %c0_22], %31 {strides = array<i32>} : memref<256x128xf32, #tpu.memory_space<vmem>>, vector<256x128xf32>,
    } else {
    }
    return
  }
  func.func @transform_0(%arg0: i32, %arg1: i32) -> (i32, i32) {
    %c0_i32 = arith.constant 0 : i32
    %c0_i32_0 = arith.constant 0 : i32
    return %arg0, %c0_i32 : i32, i32
  }
  func.func @transform_1(%arg0: i32, %arg1: i32) -> (i32, i32) {
    %c0_i32 = arith.constant 0 : i32
    %c0_i32_0 = arith.constant 0 : i32
    return %c0_i32, %arg1 : i32, i32
  }
  func.func @transform_2(%arg0: i32, %arg1: i32) -> (i32, i32) {
    %c0_i32 = arith.constant 0 : i32
    %c0_i32_0 = arith.constant 0 : i32
    %c0_i32_1 = arith.constant 0 : i32
    return %c0_i32, %c0_i32_0 : i32, i32
  }
  func.func @transform_3(%arg0: i32, %arg1: i32) -> (i32, i32) {
    %c0_i32 = arith.constant 0 : i32
    %c0_i32_0 = arith.constant 0 : i32
    return %arg1, %c0_i32 : i32, i32
  }
  func.func @transform_4(%arg0: i32, %arg1: i32) -> (i32, i32) {
    %c0_i32 = arith.constant 0 : i32
    %c0_i32_0 = arith.constant 0 : i32
    %c0_i32_1 = arith.constant 0 : i32
    return %c0_i32, %c0_i32_0 : i32, i32
  }
  func.func @transform_5(%arg0: i32, %arg1: i32) -> (i32, i32) {
    %c0_i32 = arith.constant 0 : i32
    %c0_i32_0 = arith.constant 0 : i32
    return %arg0, %c0_i32 : i32, i32
  }
}

</mosaic_0001>

<bundles_post_ra>
// kernel: tpu_custom_call.1
= control target key start
LH: loop header
LB: loop body
LE: loop exit
PB: predicated region body
PF: predicated region fallthrough
CT: control target
= control target key end

     0   :  { %10 = vsyncpa [#allocation4], 0  ;;  %s1747_s0 = inlined_call_operand.hbm [shape: f32[256,128], index: 0, kind: input, shape index: {}]   ;;  %s1748_s1 = inlined_call_operand.hbm [shape: f32[128,128], index: 1, kind: input, shape index: {}]   ;;  %s1749_s2 = inlined_call_operand.vmem [shape: f32[1,128], index: 2, kind: input, shape index: {}]   ;;  %s1750_s3 = inlined_call_operand.hbm [shape: f32[128,128], index: 3, kind: input, shape index: {}]   ;;  %s1751_s4 = inlined_call_operand.vmem [shape: f32[1,128], index: 4, kind: input, shape index: {}]   ;;  %s1752_s5 = inlined_call_operand.hbm [shape: f32[256,128], index: 5, kind: output, shape index: {}]  }
   0x1   :  { %11 = vsyncpa [#allocation7], 0 }
   0x2   :  { %12 = vsyncpa [#allocation5], 0  ;;  %s1490_s18 = smov [#allocation6]   ;;  %s1491_s20 = smov [#allocation3]  }
   0x3   :  { %s30_s19 = sshll.u32 %s1490_s18, 4  ;;  %s18_s21 = sshll.u32 %s1491_s20, 4  ;;  %s31_s19 = int_to_ptr.vmem [resolvable:$true] %s30_s19  ;;  %s1526_s21 = int_to_ptr.vmem [resolvable:$true] %s18_s21 }
   0x4   :  { %s1396_s24 = scalar_lea.hbm %s1748_s1, 2048 }
   0x5   :  { %p1397_p0 = scmp.ne.s32.totalorder %s1748_s1, %s1396_s24  ;;  %p1400_p1 = scmp.lt.u32.totalorder %s1396_s24, %s1748_s1 }
   0x7   :  { %p1402_p2 = pnand %p1400_p1, %p1397_p0 }
   0x9   :  { %1405 = shalt.err (!%p1402_p2)
}
   0xa   :  { %s1406_s29 = scalar_lea.vmem %s31_s19, 2048  ;;  %p1411_p4 = scmp.lt.s32.totalorder %s31_s19, %s31_s19 }
   0xb   :  { %p1407_p3 = scmp.ne.s32.totalorder %s31_s19, %s1406_s29  ;;  %p1412_p5 = scmp.lt.s32.totalorder %s1406_s29, %s1406_s29 }
   0xd   :  { %p1413_p6 = por %p1412_p5, %p1411_p4 }
   0xf   :  { %p1414_p7 = pnand %p1413_p6, %p1407_p3 }
  0x11   :  { %1417 = shalt.err (!%p1414_p7)
}
  0x12   :  { %s1492_s30 = smov 128   ;;  %s1493_s6 = smov 8  }
  0x13   :  { %36 = dma.hbm_to_vmem [thread:$0]  %s1748_s1, 2048, %s31_s19, [#allocation7], %s1492_s30, %s1492_s30, %s1493_s6  }
  0x14   :  { %s1418_s11 = scalar_lea.hbm %s1747_s0, 4096 }
  0x15   :  { %p1419_p8 = scmp.ne.s32.totalorder %s1747_s0, %s1418_s11  ;;  %p1422_p9 = scmp.lt.u32.totalorder %s1418_s11, %s1747_s0 }
  0x17   :  { %p1424_p10 = pnand %p1422_p9, %p1419_p8 }
  0x19   :  { %1427 = shalt.err (!%p1424_p10)
}
  0x1a   :  { %s1428_s16 = scalar_lea.vmem %s1526_s21, 4096  ;;  %p1433_p12 = scmp.lt.s32.totalorder %s1526_s21, %s1526_s21 }
  0x1b   :  { %p1429_p11 = scmp.ne.s32.totalorder %s1526_s21, %s1428_s16  ;;  %p1434_p13 = scmp.lt.s32.totalorder %s1428_s16, %s1428_s16 }
  0x1d   :  { %p1435_p0 = por %p1434_p13, %p1433_p12 }
  0x1f   :  { %p1436_p1 = pnand %p1435_p0, %p1429_p11 }
  0x21   :  { %1439 = shalt.err (!%p1436_p1)
}
  0x22   :  { %24 = dma.hbm_to_vmem [thread:$0]  %s1747_s0, 4096, %s1526_s21, [#allocation4], %s1492_s30, %s1492_s30, %s1493_s6  }
  0x23   :  { %s1494_s18 = smov [#allocation8]   ;;  %s1440_s23 = scalar_lea.hbm %s1750_s3, 2048 }
  0x24   :  { %s44_s19 = sshll.u32 %s1494_s18, 4  ;;  %p1441_p2 = scmp.ne.s32.totalorder %s1750_s3, %s1440_s23  ;;  %s45_s19 = int_to_ptr.vmem [resolvable:$true] %s44_s19 }
  0x25   :  { %p1444_p3 = scmp.lt.u32.totalorder %s1440_s23, %s1750_s3 }
  0x27   :  { %p1446_p4 = pnand %p1444_p3, %p1441_p2 }
  0x29   :  { %1449 = shalt.err (!%p1446_p4)
}
  0x2a   :  { %s1450_s28 = scalar_lea.vmem %s45_s19, 2048  ;;  %p1455_p6 = scmp.lt.s32.totalorder %s45_s19, %s45_s19 }
  0x2b   :  { %p1451_p5 = scmp.ne.s32.totalorder %s45_s19, %s1450_s28  ;;  %p1456_p7 = scmp.lt.s32.totalorder %s1450_s28, %s1450_s28 }
  0x2d   :  { %p1457_p8 = por %p1456_p7, %p1455_p6 }
  0x2f   :  { %p1458_p9 = pnand %p1457_p8, %p1451_p5 }
  0x31   :  { %1461 = shalt.err (!%p1458_p9)
}
  0x32   :  { %50 = dma.hbm_to_vmem [thread:$0]  %s1750_s3, 2048, %s45_s19, [#allocation7], %s1492_s30, %s1492_s30, %s1493_s6  }
  0x33   :  { %1484 = dma.done.wait [#allocation4], 4096  }
  0x34   :  { %1485 = vsyncadd [#allocation4], 4294963200 }
  0x35   :  { %1486 = dma.done.wait [#allocation7], 4096  }
  0x36   :  { %1487 = vsyncadd [#allocation7], 4294963200  ;;  %v130_v0 = vld [vmem:[#allocation6] sm:$0xff]  ;;  %v131_v1 = vld [vmem:[#allocation6 + $0x8] sm:$0xff] }
  0x37   :  { %v132_v2 = vld [vmem:[#allocation6 + $0x10] sm:$0xff]  ;;  %v1262_v3 = vpack.c.bf16 %v131_v1, %v130_v0  ;;  %v133_v4 = vld [vmem:[#allocation6 + $0x18] sm:$0xff]  ;;  %v134_v6 = vld [vmem:[#allocation6 + $0x20] sm:$0xff] }
  0x38   :  { %v1266_v5 = vpack.c.bf16 %v133_v4, %v132_v2  ;;  %v135_v7 = vld [vmem:[#allocation6 + $0x28] sm:$0xff]  ;;  %v98_v9 = vld [vmem:[#allocation3] sm:$0xff]  ;;  %v136_v10 = vld [vmem:[#allocation6 + $0x30] sm:$0xff] }
  0x39   :  { %1263 = vmatprep.subr.bf16.mxu0 %v1262_v3  ;;  %v1270_v8 = vpack.c.bf16 %v135_v7, %v134_v6  ;;  %v137_v11 = vld [vmem:[#allocation6 + $0x38] sm:$0xff]  ;;  %1134 = vmatprep.mubr.f32.mxu0 %v98_v9  ;;  %v138_v13 = vld [vmem:[#allocation6 + $0x40] sm:$0xff]  ;;  %v139_v14 = vld [vmem:[#allocation6 + $0x48] sm:$0xff] }
  0x3a   :  { %1265 = vmatpush3.bf16.msra.mxu0 %v1262_v3  ;;  %v1274_v12 = vpack.c.bf16 %v137_v11, %v136_v10  ;;  %v1278_v15 = vpack.c.bf16 %v139_v14, %v138_v13  ;;  %v140_v16 = vld [vmem:[#allocation6 + $0x50] sm:$0xff]  ;;  %v141_v17 = vld [vmem:[#allocation6 + $0x58] sm:$0xff]  ;;  %v574_v18 = vld [vmem:[#allocation8] sm:$0xff] }
  0x3b   :  { %1267 = vmatprep.subr.bf16.mxu0 %v1266_v5  ;;  %v575_v19 = vld [vmem:[#allocation8 + $0x8] sm:$0xff]  ;;  %v576_v20 = vld [vmem:[#allocation8 + $0x10] sm:$0xff]  ;;  %v1282_v21 = vpack.c.bf16 %v141_v17, %v140_v16  ;;  %v142_v22 = vld [vmem:[#allocation6 + $0x60] sm:$0xff] }
  0x3c   :  { %v1294_v23 = vpack.c.bf16 %v575_v19, %v574_v18  ;;  %v577_v24 = vld [vmem:[#allocation8 + $0x18] sm:$0xff]  ;;  %v143_v25 = vld [vmem:[#allocation6 + $0x68] sm:$0xff]  ;;  %v578_v27 = vld [vmem:[#allocation8 + $0x20] sm:$0xff] }
  0x3d   :  { %v1298_v26 = vpack.c.bf16 %v577_v24, %v576_v20  ;;  %v579_v28 = vld [vmem:[#allocation8 + $0x28] sm:$0xff]  ;;  %v1286_v29 = vpack.c.bf16 %v143_v25, %v142_v22  ;;  %v144_v31 = vld [vmem:[#allocation6 + $0x70] sm:$0xff]  ;;  %v145_v32 = vld [vmem:[#allocation6 + $0x78] sm:$0xff] }
  0x3e   :  { %1269 = vmatpush3.bf16.msra.mxu0 %v1266_v5  ;;  %1295 = vmatprep.subr.bf16.mxu1 %v1294_v23  ;;  %v1302_v30 = vpack.c.bf16 %v579_v28, %v578_v27  ;;  %v1290_v33 = vpack.c.bf16 %v145_v32, %v144_v31  ;;  %v99_v34 = vld [vmem:[#allocation3 + $0x8] sm:$0xff]  ;;  %v100_v35 = vld [vmem:[#allocation3 + $0x10] sm:$0xff]  ;;  %v101_v36 = vld [vmem:[#allocation3 + $0x18] sm:$0xff] }
  0x3f   :  { %1271 = vmatprep.subr.bf16.mxu0 %v1270_v8  ;;  %1297 = vmatpush3.bf16.msra.mxu1 %v1294_v23  ;;  %v102_v37 = vld [vmem:[#allocation3 + $0x20] sm:$0xff]  ;;  %v103_v38 = vld [vmem:[#allocation3 + $0x28] sm:$0xff]  ;;  %v104_v39 = vld [vmem:[#allocation3 + $0x30] sm:$0xff] }
  0x40   :  { %1299 = vmatprep.subr.bf16.mxu1 %v1298_v26  ;;  %v105_v40 = vld [vmem:[#allocation3 + $0x38] sm:$0xff]  ;;  %v106_v41 = vld [vmem:[#allocation3 + $0x40] sm:$0xff]  ;;  %v107_v42 = vld [vmem:[#allocation3 + $0x48] sm:$0xff] }
  0x41   :  { %v108_v43 = vld [vmem:[#allocation3 + $0x50] sm:$0xff]  ;;  %v109_v44 = vld [vmem:[#allocation3 + $0x58] sm:$0xff]  ;;  %v110_v45 = vld [vmem:[#allocation3 + $0x60] sm:$0xff] }
  0x42   :  { %1273 = vmatpush3.bf16.msra.mxu0 %v1270_v8  ;;  %v111_v46 = vld [vmem:[#allocation3 + $0x68] sm:$0xff]  ;;  %v112_v47 = vld [vmem:[#allocation3 + $0x70] sm:$0xff]  ;;  %v113_v48 = vld [vmem:[#allocation3 + $0x78] sm:$0xff] }
  0x43   :  { %1275 = vmatprep.subr.bf16.mxu0 %v1274_v12  ;;  %1301 = vmatpush3.bf16.msra.mxu1 %v1298_v26  ;;  %v114_v49 = vld [vmem:[#allocation3 + $0x80] sm:$0xff]  ;;  %v115_v50 = vld [vmem:[#allocation3 + $0x88] sm:$0xff]  ;;  %v116_v51 = vld [vmem:[#allocation3 + $0x90] sm:$0xff] }
  0x44   :  { %1303 = vmatprep.subr.bf16.mxu1 %v1302_v30  ;;  %v117_v52 = vld [vmem:[#allocation3 + $0x98] sm:$0xff]  ;;  %v118_v53 = vld [vmem:[#allocation3 + $0xa0] sm:$0xff]  ;;  %v119_v54 = vld [vmem:[#allocation3 + $0xa8] sm:$0xff] }
  0x45   :  { %v120_v55 = vld [vmem:[#allocation3 + $0xb0] sm:$0xff]  ;;  %v121_v56 = vld [vmem:[#allocation3 + $0xb8] sm:$0xff]  ;;  %v122_v57 = vld [vmem:[#allocation3 + $0xc0] sm:$0xff] }
  0x46   :  { %1277 = vmatpush3.bf16.msra.mxu0 %v1274_v12  ;;  %v123_v58 = vld [vmem:[#allocation3 + $0xc8] sm:$0xff]  ;;  %v124_v59 = vld [vmem:[#allocation3 + $0xd0] sm:$0xff]  ;;  %v125_v60 = vld [vmem:[#allocation3 + $0xd8] sm:$0xff] }
  0x47   :  { %1279 = vmatprep.subr.bf16.mxu0 %v1278_v15  ;;  %1305 = vmatpush3.bf16.msra.mxu1 %v1302_v30  ;;  %v126_v61 = vld [vmem:[#allocation3 + $0xe0] sm:$0xff]  ;;  %v127_v62 = vld [vmem:[#allocation3 + $0xe8] sm:$0xff]  ;;  %v128_v63 = vld [vmem:[#allocation3 + $0xf0] sm:$0xff] }
  0x48   :  { %v129_v0 = vld [vmem:[#allocation3 + $0xf8] sm:$0xff]  ;;  %v580_v1 = vld [vmem:[#allocation8 + $0x30] sm:$0xff]  ;;  %v582_v4 = vld [vmem:[#allocation8 + $0x40] sm:$0xff] }
  0x49   :  { %v581_v2 = vld [vmem:[#allocation8 + $0x38] sm:$0xff]  ;;  %v583_v5 = vld [vmem:[#allocation8 + $0x48] sm:$0xff]  ;;  %v584_v7 = vld [vmem:[#allocation8 + $0x50] sm:$0xff] }
  0x4a   :  { %1281 = vmatpush3.bf16.msra.mxu0 %v1278_v15  ;;  %v1306_v3 = vpack.c.bf16 %v581_v2, %v580_v1  ;;  %v1310_v6 = vpack.c.bf16 %v583_v5, %v582_v4  ;;  %v585_v8 = vld [vmem:[#allocation8 + $0x58] sm:$0xff]  ;;  %v586_v10 = vld [vmem:[#allocation8 + $0x60] sm:$0xff]  ;;  %v587_v11 = vld [vmem:[#allocation8 + $0x68] sm:$0xff] }
  0x4b   :  { %1283 = vmatprep.subr.bf16.mxu0 %v1282_v21  ;;  %v1314_v9 = vpack.c.bf16 %v585_v8, %v584_v7  ;;  %v1318_v12 = vpack.c.bf16 %v587_v11, %v586_v10  ;;  %v588_v13 = vld [vmem:[#allocation8 + $0x70] sm:$0xff]  ;;  %v589_v14 = vld [vmem:[#allocation8 + $0x78] sm:$0xff]  ;;  %v1581_v16 = vld [vmem:[%s1749_s2] ss:$0 sm:$0xff] }
  0x4c   :  { %1307 = vmatprep.subr.bf16.mxu1 %v1306_v3  ;;  %v1322_v15 = vpack.c.bf16 %v589_v14, %v588_v13 }
  0x4d   :  { %1309 = vmatpush3.bf16.msra.mxu1 %v1306_v3 }
  0x4e   :  { %1285 = vmatpush3.bf16.msra.mxu0 %v1282_v21  ;;  %1311 = vmatprep.subr.bf16.mxu1 %v1310_v6 }
  0x4f   :  { %1287 = vmatprep.subr.bf16.mxu0 %v1286_v29 }
  0x51   :  { %1313 = vmatpush3.bf16.msra.mxu1 %v1310_v6 }
  0x52   :  { %1289 = vmatpush3.bf16.msra.mxu0 %v1286_v29  ;;  %1315 = vmatprep.subr.bf16.mxu1 %v1314_v9 }
  0x53   :  { %1291 = vmatprep.subr.bf16.mxu0 %v1290_v33 }
  0x55   :  { %1317 = vmatpush3.bf16.msra.mxu1 %v1314_v9 }
  0x56   :  { %1293 = vmatpush3.bf16.msra.mxu0 %v1290_v33  ;;  %1319 = vmatprep.subr.bf16.mxu1 %v1318_v12 }
  0x59   :  { %1135 = vmatmul.mubr.f32.vlgmr.msra.gmra.mrb[0].mxu0 %v99_v34  ;;  %1321 = vmatpush3.bf16.msra.mxu1 %v1318_v12 }
  0x5a   :  { %1137 = vmatprep.mubr.f32.mxu0 %v100_v35  ;;  %1323 = vmatprep.subr.bf16.mxu1 %v1322_v15 }
  0x5d   :  { %1138 = vmatmul.mubr.f32.gmra.mrb[2].mxu0 %v101_v36  ;;  %1325 = vmatpush3.bf16.msra.mxu1 %v1322_v15 }
  0x5e   :  { %1140 = vmatprep.mubr.f32.mxu0 %v102_v37 }
  0x61   :  { %1141 = vmatmul.mubr.f32.gmra.mrb[4].mxu0 %v103_v38 }
  0x62   :  { %1143 = vmatprep.mubr.f32.mxu0 %v104_v39 }
  0x65   :  { %1144 = vmatmul.mubr.f32.gmra.mrb[6].mxu0 %v105_v40 }
  0x66   :  { %1146 = vmatprep.mubr.f32.mxu0 %v106_v41 }
  0x69   :  { %1147 = vmatmul.mubr.f32.gmra.mrb[8].mxu0 %v107_v42 }
  0x6a   :  { %1149 = vmatprep.mubr.f32.mxu0 %v108_v43 }
  0x6d   :  { %1150 = vmatmul.mubr.f32.gmra.mrb[10].mxu0 %v109_v44 }
  0x6e   :  { %1152 = vmatprep.mubr.f32.mxu0 %v110_v45 }
  0x71   :  { %1153 = vmatmul.mubr.f32.gmra.mrb[12].mxu0 %v111_v46 }
  0x72   :  { %1155 = vmatprep.mubr.f32.mxu0 %v112_v47 }
  0x75   :  { %1156 = vmatmul.mubr.f32.gmra.mrb[14].mxu0 %v113_v48 }
  0x76   :  { %1158 = vmatprep.mubr.f32.mxu0 %v114_v49 }
  0x79   :  { %1159 = vmatmul.mubr.f32.gmra.mrb[16].mxu0 %v115_v50 }
  0x7a   :  { %1161 = vmatprep.mubr.f32.mxu0 %v116_v51 }
  0x7d   :  { %1162 = vmatmul.mubr.f32.gmra.mrb[18].mxu0 %v117_v52 }
  0x7e   :  { %1164 = vmatprep.mubr.f32.mxu0 %v118_v53 }
  0x81   :  { %1165 = vmatmul.mubr.f32.gmra.mrb[20].mxu0 %v119_v54 }
  0x82   :  { %1167 = vmatprep.mubr.f32.mxu0 %v120_v55 }
  0x85   :  { %1168 = vmatmul.mubr.f32.gmra.mrb[22].mxu0 %v121_v56 }
  0x86   :  { %1170 = vmatprep.mubr.f32.mxu0 %v122_v57 }
  0x89   :  { %1171 = vmatmul.mubr.f32.gmra.mrb[24].mxu0 %v123_v58 }
  0x8a   :  { %1173 = vmatprep.mubr.f32.mxu0 %v124_v59 }
  0x8d   :  { %1174 = vmatmul.mubr.f32.gmra.mrb[26].mxu0 %v125_v60 }
  0x8e   :  { %1176 = vmatprep.mubr.f32.mxu0 %v126_v61 }
  0x91   :  { %1177 = vmatmul.mubr.f32.gmra.mrb[28].mxu0 %v127_v62 }
  0x92   :  { %1179 = vmatprep.mubr.f32.mxu0 %v128_v63 }
  0x95   :  { %1180 = vmatmul.mubr.f32.gmra.mrb[30].mxu0 %v129_v0 }
 0x12c   :  { %v1136_v17 = vpop.f32.mrb[0].mxu0 }
 0x12d   :  { %v229_v18 = vadd.f32 %v1136_v17, %v1581_v16  ;;  %v223_v19 = vpop.f32.mrb[1].mxu0 }
 0x12e   :  { %v224_v20 = vadd.f32 %v1581_v16, %v223_v19 }
 0x12f   :  { %v415_v21 = vmul.f32 0.70710677, %v229_v18  ;;  %v383_v49 = vmul.f32 0.5, %v229_v18 }
 0x130   :  { %v414_v22 = vmul.f32 0.70710677, %v224_v20  ;;  %v1139_v23 = vpop.f32.mrb[2].mxu0  ;;  %v382_v47 = vmul.f32 0.5, %v224_v20 }
 0x131   :  { %1332 = verf.f32 %v415_v21  ;;  %v239_v24 = vadd.f32 %v1139_v23, %v1581_v16  ;;  %v233_v25 = vpop.f32.mrb[3].mxu0 }
 0x132   :  { %1334 = verf.f32 %v414_v22  ;;  %v234_v26 = vadd.f32 %v1581_v16, %v233_v25 }
 0x133   :  { %v417_v27 = vmul.f32 0.70710677, %v239_v24  ;;  %v385_v63 = vmul.f32 0.5, %v239_v24 }
 0x134   :  { %v416_v28 = vmul.f32 0.70710677, %v234_v26  ;;  %v1142_v29 = vpop.f32.mrb[4].mxu0  ;;  %v384_v59 = vmul.f32 0.5, %v234_v26 }
 0x135   :  { %1336 = verf.f32 %v417_v27  ;;  %v249_v30 = vadd.f32 %v1142_v29, %v1581_v16  ;;  %v243_v31 = vpop.f32.mrb[5].mxu0 }
 0x136   :  { %1338 = verf.f32 %v416_v28  ;;  %v244_v32 = vadd.f32 %v1581_v16, %v243_v31 }
 0x137   :  { %v419_v33 = vmul.f32 0.70710677, %v249_v30  ;;  %v387_v13 = vmul.f32 0.5, %v249_v30 }
 0x138   :  { %v418_v34 = vmul.f32 0.70710677, %v244_v32  ;;  %v1145_v35 = vpop.f32.mrb[6].mxu0  ;;  %v386_v9 = vmul.f32 0.5, %v244_v32 }
 0x139   :  { %1340 = verf.f32 %v419_v33  ;;  %v1590_v36 = vadd.f32 %v1145_v35, %v1581_v16  ;;  %v253_v37 = vpop.f32.mrb[7].mxu0 }
 0x13a   :  { %1342 = verf.f32 %v418_v34  ;;  %v254_v38 = vadd.f32 %v1581_v16, %v253_v37 }
 0x13b   :  { %v1333_v39 = vpop.eup %1332  ;;  %v421_v40 = vmul.f32 0.70710677, %v1590_v36  ;;  %v389_v28 = vmul.f32 0.5, %v1590_v36 }
 0x13c   :  { %v1335_v41 = vpop.eup %1334  ;;  %v479_v42 = vadd.f32 1.0, %v1333_v39  ;;  %v420_v43 = vmul.f32 0.70710677, %v254_v38  ;;  %v1148_v44 = vpop.f32.mrb[8].mxu0  ;;  %v388_v24 = vmul.f32 0.5, %v254_v38 }
 0x13d   :  { %1344 = verf.f32 %v421_v40  ;;  %v1595_v45 = vadd.f32 %v1148_v44, %v1581_v16  ;;  %v263_v46 = vpop.f32.mrb[9].mxu0  ;;  %v478_v48 = vadd.f32 1.0, %v1335_v41 }
 0x13e   :  { %1346 = verf.f32 %v420_v43  ;;  %v1598_v50 = vadd.f32 %v1581_v16, %v263_v46  ;;  %v511_v58 = vmul.f32 %v479_v42, %v383_v49 }
 0x13f   :  { %v1337_v51 = vpop.eup %1336  ;;  %v423_v52 = vmul.f32 0.70710677, %v1595_v45  ;;  %v510_v53 = vmul.f32 %v478_v48, %v382_v47  ;;  %v391_v42 = vmul.f32 0.5, %v1595_v45 }
 0x140   :  { %v1339_v54 = vpop.eup %1338  ;;  %v481_v55 = vadd.f32 1.0, %v1337_v51  ;;  %v422_v56 = vmul.f32 0.70710677, %v1598_v50  ;;  %v1151_v57 = vpop.f32.mrb[10].mxu0  ;;  %v390_v39 = vmul.f32 0.5, %v1598_v50 }
 0x141   :  { %v480_v60 = vadd.f32 1.0, %v1339_v54  ;;  %1348 = verf.f32 %v423_v52  ;;  %v1603_v61 = vadd.f32 %v1151_v57, %v1581_v16  ;;  %v273_v62 = vpop.f32.mrb[11].mxu0  ;;  %1214 = vmatprep.mubr.f32.mxu1 %v510_v53 }
 0x142   :  { %1350 = verf.f32 %v422_v56  ;;  %v1606_v0 = vadd.f32 %v1581_v16, %v273_v62  ;;  %1215 = vmatmul.mubr.f32.vlgmr.msra.gmra.mrb[0].mxu1 %v511_v58  ;;  %v513_v8 = vmul.f32 %v481_v55, %v385_v63 }
 0x143   :  { %v1341_v1 = vpop.eup %1340  ;;  %v425_v2 = vmul.f32 0.70710677, %v1603_v61  ;;  %v512_v3 = vmul.f32 %v480_v60, %v384_v59  ;;  %v393_v56 = vmul.f32 0.5, %v1603_v61 }
 0x144   :  { %v1343_v4 = vpop.eup %1342  ;;  %v483_v5 = vadd.f32 1.0, %v1341_v1  ;;  %v424_v6 = vmul.f32 0.70710677, %v1606_v0  ;;  %v1154_v7 = vpop.f32.mrb[12].mxu0  ;;  %v392_v53 = vmul.f32 0.5, %v1606_v0 }
 0x145   :  { %v482_v10 = vadd.f32 1.0, %v1343_v4  ;;  %1352 = verf.f32 %v425_v2  ;;  %v1611_v11 = vadd.f32 %v1154_v7, %v1581_v16  ;;  %v283_v12 = vpop.f32.mrb[13].mxu0  ;;  %1217 = vmatprep.mubr.f32.mxu1 %v512_v3 }
 0x146   :  { %1354 = verf.f32 %v424_v6  ;;  %v1614_v14 = vadd.f32 %v1581_v16, %v283_v12  ;;  %1218 = vmatmul.mubr.f32.gmra.mrb[2].mxu1 %v513_v8  ;;  %v515_v23 = vmul.f32 %v483_v5, %v387_v13 }
 0x147   :  { %v1345_v15 = vpop.eup %1344  ;;  %v427_v17 = vmul.f32 0.70710677, %v1611_v11  ;;  %v514_v18 = vmul.f32 %v482_v10, %v386_v9  ;;  %v395_v6 = vmul.f32 0.5, %v1611_v11 }
 0x148   :  { %v1347_v19 = vpop.eup %1346  ;;  %v485_v20 = vadd.f32 1.0, %v1345_v15  ;;  %v426_v21 = vmul.f32 0.70710677, %v1614_v14  ;;  %v1157_v22 = vpop.f32.mrb[14].mxu0  ;;  %v394_v3 = vmul.f32 0.5, %v1614_v14 }
 0x149   :  { %v484_v25 = vadd.f32 1.0, %v1347_v19  ;;  %1356 = verf.f32 %v427_v17  ;;  %v1619_v26 = vadd.f32 %v1157_v22, %v1581_v16  ;;  %v293_v27 = vpop.f32.mrb[15].mxu0  ;;  %1220 = vmatprep.mubr.f32.mxu1 %v514_v18 }
 0x14a   :  { %1358 = verf.f32 %v426_v21  ;;  %v1623_v29 = vadd.f32 %v1581_v16, %v293_v27  ;;  %1221 = vmatmul.mubr.f32.gmra.mrb[4].mxu1 %v515_v23  ;;  %v517_v38 = vmul.f32 %v485_v20, %v389_v28 }
 0x14b   :  { %v1349_v30 = vpop.eup %1348  ;;  %v429_v31 = vmul.f32 0.70710677, %v1619_v26  ;;  %v516_v32 = vmul.f32 %v484_v25, %v388_v24  ;;  %v397_v21 = vmul.f32 0.5, %v1619_v26 }
 0x14c   :  { %v1351_v33 = vpop.eup %1350  ;;  %v487_v34 = vadd.f32 1.0, %v1349_v30  ;;  %v428_v35 = vmul.f32 0.70710677, %v1623_v29  ;;  %v1160_v37 = vpop.f32.mrb[16].mxu0  ;;  %v396_v18 = vmul.f32 0.5, %v1623_v29 }
 0x14d   :  { %v486_v40 = vadd.f32 1.0, %v1351_v33  ;;  %1360 = verf.f32 %v429_v31  ;;  %v1629_v36 = vadd.f32 %v1160_v37, %v1581_v16  ;;  %v303_v41 = vpop.f32.mrb[17].mxu0  ;;  %1223 = vmatprep.mubr.f32.mxu1 %v516_v32 }
 0x14e   :  { %1362 = verf.f32 %v428_v35  ;;  %v1633_v43 = vadd.f32 %v1581_v16, %v303_v41  ;;  %1224 = vmatmul.mubr.f32.gmra.mrb[6].mxu1 %v517_v38  ;;  %v519_v52 = vmul.f32 %v487_v34, %v391_v42 }
 0x14f   :  { %v1353_v44 = vpop.eup %1352  ;;  %v431_v46 = vmul.f32 0.70710677, %v1629_v36  ;;  %v518_v47 = vmul.f32 %v486_v40, %v390_v39  ;;  %v399_v35 = vmul.f32 0.5, %v1629_v36 }
 0x150   :  { %v1355_v48 = vpop.eup %1354  ;;  %v489_v49 = vadd.f32 1.0, %v1353_v44  ;;  %v430_v50 = vmul.f32 0.70710677, %v1633_v43  ;;  %v1163_v51 = vpop.f32.mrb[18].mxu0  ;;  %v398_v32 = vmul.f32 0.5, %v1633_v43 }
 0x151   :  { %v488_v54 = vadd.f32 1.0, %v1355_v48  ;;  %1364 = verf.f32 %v431_v46  ;;  %v1639_v45 = vadd.f32 %v1163_v51, %v1581_v16  ;;  %v313_v55 = vpop.f32.mrb[19].mxu0  ;;  %1226 = vmatprep.mubr.f32.mxu1 %v518_v47 }
 0x152   :  { %1366 = verf.f32 %v430_v50  ;;  %v1643_v57 = vadd.f32 %v1581_v16, %v313_v55  ;;  %1227 = vmatmul.mubr.f32.gmra.mrb[8].mxu1 %v519_v52  ;;  %v521_v2 = vmul.f32 %v489_v49, %v393_v56 }
 0x153   :  { %v1357_v58 = vpop.eup %1356  ;;  %v433_v59 = vmul.f32 0.70710677, %v1639_v45  ;;  %v520_v60 = vmul.f32 %v488_v54, %v392_v53  ;;  %v401_v50 = vmul.f32 0.5, %v1639_v45 }
 0x154   :  { %v1359_v62 = vpop.eup %1358  ;;  %v491_v63 = vadd.f32 1.0, %v1357_v58  ;;  %v432_v0 = vmul.f32 0.70710677, %v1643_v57  ;;  %v1166_v1 = vpop.f32.mrb[20].mxu0  ;;  %v400_v47 = vmul.f32 0.5, %v1643_v57 }
 0x155   :  { %v490_v4 = vadd.f32 1.0, %v1359_v62  ;;  %1368 = verf.f32 %v433_v59  ;;  %v1649_v61 = vadd.f32 %v1166_v1, %v1581_v16  ;;  %v323_v5 = vpop.f32.mrb[21].mxu0  ;;  %1229 = vmatprep.mubr.f32.mxu1 %v520_v60 }
 0x156   :  { %1370 = verf.f32 %v432_v0  ;;  %v1653_v7 = vadd.f32 %v1581_v16, %v323_v5  ;;  %1230 = vmatmul.mubr.f32.gmra.mrb[10].mxu1 %v521_v2  ;;  %v523_v17 = vmul.f32 %v491_v63, %v395_v6 }
 0x157   :  { %v1361_v8 = vpop.eup %1360  ;;  %v435_v9 = vmul.f32 0.70710677, %v1649_v61  ;;  %v522_v10 = vmul.f32 %v490_v4, %v394_v3  ;;  %v403_v0 = vmul.f32 0.5, %v1649_v61 }
 0x158   :  { %v1363_v12 = vpop.eup %1362  ;;  %v493_v13 = vadd.f32 1.0, %v1361_v8  ;;  %v434_v14 = vmul.f32 0.70710677, %v1653_v7  ;;  %v1169_v15 = vpop.f32.mrb[22].mxu0  ;;  %v402_v60 = vmul.f32 0.5, %v1653_v7 }
 0x159   :  { %v492_v19 = vadd.f32 1.0, %v1363_v12  ;;  %1372 = verf.f32 %v435_v9  ;;  %v1659_v11 = vadd.f32 %v1169_v15, %v1581_v16  ;;  %v333_v20 = vpop.f32.mrb[23].mxu0  ;;  %1232 = vmatprep.mubr.f32.mxu1 %v522_v10 }
 0x15a   :  { %1374 = verf.f32 %v434_v14  ;;  %v1663_v22 = vadd.f32 %v1581_v16, %v333_v20  ;;  %1233 = vmatmul.mubr.f32.gmra.mrb[12].mxu1 %v523_v17  ;;  %v525_v31 = vmul.f32 %v493_v13, %v397_v21 }
 0x15b   :  { %v1365_v23 = vpop.eup %1364  ;;  %v437_v24 = vmul.f32 0.70710677, %v1659_v11  ;;  %v524_v25 = vmul.f32 %v492_v19, %v396_v18  ;;  %v405_v61 = vmul.f32 0.5, %v1659_v11 }
 0x15c   :  { %v1367_v27 = vpop.eup %1366  ;;  %v495_v28 = vadd.f32 1.0, %v1365_v23  ;;  %v436_v29 = vmul.f32 0.70710677, %v1663_v22  ;;  %v1172_v30 = vpop.f32.mrb[24].mxu0  ;;  %v404_v10 = vmul.f32 0.5, %v1663_v22 }
 0x15d   :  { %v494_v33 = vadd.f32 1.0, %v1367_v27  ;;  %1376 = verf.f32 %v437_v24  ;;  %v1669_v26 = vadd.f32 %v1172_v30, %v1581_v16  ;;  %v343_v34 = vpop.f32.mrb[25].mxu0  ;;  %1235 = vmatprep.mubr.f32.mxu1 %v524_v25 }
 0x15e   :  { %1378 = verf.f32 %v436_v29  ;;  %v1673_v37 = vadd.f32 %v1581_v16, %v343_v34  ;;  %1236 = vmatmul.mubr.f32.gmra.mrb[14].mxu1 %v525_v31  ;;  %v527_v46 = vmul.f32 %v495_v28, %v399_v35 }
 0x15f   :  { %v1369_v38 = vpop.eup %1368  ;;  %v439_v39 = vmul.f32 0.70710677, %v1669_v26  ;;  %v526_v40 = vmul.f32 %v494_v33, %v398_v32  ;;  %v407_v27 = vmul.f32 0.5, %v1669_v26 }
 0x160   :  { %v1371_v41 = vpop.eup %1370  ;;  %v497_v42 = vadd.f32 1.0, %v1369_v38  ;;  %v438_v43 = vmul.f32 0.70710677, %v1673_v37  ;;  %v1175_v44 = vpop.f32.mrb[26].mxu0  ;;  %v406_v22 = vmul.f32 0.5, %v1673_v37 }
 0x161   :  { %v496_v48 = vadd.f32 1.0, %v1371_v41  ;;  %1380 = verf.f32 %v439_v39  ;;  %v1679_v36 = vadd.f32 %v1175_v44, %v1581_v16  ;;  %v353_v49 = vpop.f32.mrb[27].mxu0  ;;  %1238 = vmatprep.mubr.f32.mxu1 %v526_v40 }
 0x162   :  { %1382 = verf.f32 %v438_v43  ;;  %v354_v51 = vadd.f32 %v1581_v16, %v353_v49  ;;  %1239 = vmatmul.mubr.f32.gmra.mrb[16].mxu1 %v527_v46  ;;  %v529_v59 = vmul.f32 %v497_v42, %v401_v50 }
 0x163   :  { %v1373_v52 = vpop.eup %1372  ;;  %v441_v53 = vmul.f32 0.70710677, %v1679_v36  ;;  %v528_v54 = vmul.f32 %v496_v48, %v400_v47  ;;  %v409_v33 = vmul.f32 0.5, %v1679_v36 }
 0x164   :  { %v1375_v55 = vpop.eup %1374  ;;  %v499_v56 = vadd.f32 1.0, %v1373_v52  ;;  %v440_v57 = vmul.f32 0.70710677, %v354_v51  ;;  %v1178_v58 = vpop.f32.mrb[28].mxu0  ;;  %v408_v31 = vmul.f32 0.5, %v354_v51 }
 0x165   :  { %v498_v62 = vadd.f32 1.0, %v1375_v55  ;;  %1384 = verf.f32 %v441_v53  ;;  %v369_v63 = vadd.f32 %v1178_v58, %v1581_v16  ;;  %v363_v45 = vpop.f32.mrb[29].mxu0  ;;  %1241 = vmatprep.mubr.f32.mxu1 %v528_v54  ;;  %v1698_v52 = vld [vmem:[%s1751_s4] ss:$0 sm:$0xff]  ;;  %s1495_s4 = smov [#allocation9]  }
 0x166   :  { %1386 = verf.f32 %v440_v57  ;;  %v364_v1 = vadd.f32 %v1581_v16, %v363_v45  ;;  %1242 = vmatmul.mubr.f32.gmra.mrb[18].mxu1 %v529_v59  ;;  %v531_v7 = vmul.f32 %v499_v56, %v403_v0  ;;  %s990_s8 = sshll.u32 %s1495_s4, 4  ;;  %s991_s8 = int_to_ptr.vmem [resolvable:$true] %s990_s8 }
 0x167   :  { %v1377_v2 = vpop.eup %1376  ;;  %v443_v3 = vmul.f32 0.70710677, %v369_v63  ;;  %v530_v4 = vmul.f32 %v498_v62, %v402_v60  ;;  %v411_v41 = vmul.f32 0.5, %v369_v63  ;;  %s1462_s9 = scalar_lea.vmem %s991_s8, 4096  ;;  %p1467_p11 = scmp.lt.s32.totalorder %s991_s8, %s991_s8 }
 0x168   :  { %v1379_v5 = vpop.eup %1378  ;;  %v501_v6 = vadd.f32 1.0, %v1377_v2  ;;  %v442_v8 = vmul.f32 0.70710677, %v364_v1  ;;  %v1181_v9 = vpop.f32.mrb[30].mxu0  ;;  %v410_v40 = vmul.f32 0.5, %v364_v1  ;;  %p1463_p10 = scmp.ne.s32.totalorder %s991_s8, %s1462_s9  ;;  %p1468_p12 = scmp.lt.s32.totalorder %s1462_s9, %s1462_s9 }
 0x169   :  { %v500_v12 = vadd.f32 1.0, %v1379_v5  ;;  %1388 = verf.f32 %v443_v3  ;;  %v379_v13 = vadd.f32 %v1181_v9, %v1581_v16  ;;  %v373_v14 = vpop.f32.mrb[31].mxu0  ;;  %1244 = vmatprep.mubr.f32.mxu1 %v530_v4 }
 0x16a   :  { %1390 = verf.f32 %v442_v8  ;;  %v374_v15 = vadd.f32 %v1581_v16, %v373_v14  ;;  %1245 = vmatmul.mubr.f32.gmra.mrb[20].mxu1 %v531_v7  ;;  %v533_v24 = vmul.f32 %v501_v6, %v405_v61  ;;  %p1469_p13 = por %p1468_p12, %p1467_p11 }
 0x16b   :  { %v1381_v17 = vpop.eup %1380  ;;  %v445_v18 = vmul.f32 0.70710677, %v379_v13  ;;  %v532_v19 = vmul.f32 %v500_v12, %v404_v10  ;;  %v413_v36 = vmul.f32 0.5, %v379_v13 }
 0x16c   :  { %v1383_v20 = vpop.eup %1382  ;;  %v503_v21 = vadd.f32 1.0, %v1381_v17  ;;  %v444_v23 = vmul.f32 0.70710677, %v374_v15  ;;  %v412_v48 = vmul.f32 0.5, %v374_v15  ;;  %p1470_p0 = pnand %p1469_p13, %p1463_p10 }
 0x16d   :  { %v502_v25 = vadd.f32 1.0, %v1383_v20  ;;  %1392 = verf.f32 %v445_v18  ;;  %1247 = vmatprep.mubr.f32.mxu1 %v532_v19 }
 0x16e   :  { %1394 = verf.f32 %v444_v23  ;;  %1248 = vmatmul.mubr.f32.gmra.mrb[22].mxu1 %v533_v24  ;;  %v535_v30 = vmul.f32 %v503_v21, %v407_v27 }
 0x16f   :  { %v1385_v11 = vpop.eup %1384  ;;  %v534_v28 = vmul.f32 %v502_v25, %v406_v22 }
 0x170   :  { %v1387_v16 = vpop.eup %1386  ;;  %v505_v29 = vadd.f32 1.0, %v1385_v11 }
 0x171   :  { %v504_v32 = vadd.f32 1.0, %v1387_v16  ;;  %1250 = vmatprep.mubr.f32.mxu1 %v534_v28 }
 0x172   :  { %1251 = vmatmul.mubr.f32.gmra.mrb[24].mxu1 %v535_v30  ;;  %v537_v39 = vmul.f32 %v505_v29, %v409_v33 }
 0x173   :  { %v1389_v34 = vpop.eup %1388  ;;  %v536_v35 = vmul.f32 %v504_v32, %v408_v31 }
 0x174   :  { %v1391_v37 = vpop.eup %1390  ;;  %v507_v38 = vadd.f32 1.0, %v1389_v34 }
 0x175   :  { %v506_v26 = vadd.f32 1.0, %v1391_v37  ;;  %1253 = vmatprep.mubr.f32.mxu1 %v536_v35 }
 0x176   :  { %1254 = vmatmul.mubr.f32.gmra.mrb[26].mxu1 %v537_v39  ;;  %v539_v47 = vmul.f32 %v507_v38, %v411_v41 }
 0x177   :  { %v1393_v42 = vpop.eup %1392  ;;  %v538_v43 = vmul.f32 %v506_v26, %v410_v40 }
 0x178   :  { %v1395_v44 = vpop.eup %1394  ;;  %v509_v46 = vadd.f32 1.0, %v1393_v42 }
 0x179   :  { %v508_v49 = vadd.f32 1.0, %v1395_v44  ;;  %1256 = vmatprep.mubr.f32.mxu1 %v538_v43 }
 0x17a   :  { %1257 = vmatmul.mubr.f32.gmra.mrb[28].mxu1 %v539_v47  ;;  %v541_v51 = vmul.f32 %v509_v46, %v413_v36 }
 0x17b   :  { %v540_v50 = vmul.f32 %v508_v49, %v412_v48 }
 0x17d   :  { %1259 = vmatprep.mubr.f32.mxu1 %v540_v50 }
 0x17e   :  { %1260 = vmatmul.mubr.f32.gmra.mrb[30].mxu1 %v541_v51 }
 0x215   :  { %v1216_v53 = vpop.f32.mrb[0].mxu1 }
 0x216   :  { %v922_v54 = vadd.f32 %v1216_v53, %v1698_v52  ;;  %v656_v55 = vpop.f32.mrb[1].mxu1 }
 0x217   :  { %v921_v56 = vadd.f32 %v1698_v52, %v656_v55 }
 0x218   :  { %954 = vst [vmem:[#allocation9 + $0x8] sm:$0xff] %v922_v54 }
 0x219   :  { %953 = vst [vmem:[#allocation9] sm:$0xff] %v921_v56  ;;  %v1219_v57 = vpop.f32.mrb[2].mxu1 }
 0x21a   :  { %v924_v58 = vadd.f32 %v1219_v57, %v1698_v52  ;;  %v666_v59 = vpop.f32.mrb[3].mxu1 }
 0x21b   :  { %v923_v60 = vadd.f32 %v1698_v52, %v666_v59 }
 0x21c   :  { %956 = vst [vmem:[#allocation9 + $0x18] sm:$0xff] %v924_v58 }
 0x21d   :  { %955 = vst [vmem:[#allocation9 + $0x10] sm:$0xff] %v923_v60  ;;  %v1222_v62 = vpop.f32.mrb[4].mxu1 }
 0x21e   :  { %v926_v63 = vadd.f32 %v1222_v62, %v1698_v52  ;;  %v676_v45 = vpop.f32.mrb[5].mxu1 }
 0x21f   :  { %v925_v0 = vadd.f32 %v1698_v52, %v676_v45 }
 0x220   :  { %958 = vst [vmem:[#allocation9 + $0x28] sm:$0xff] %v926_v63 }
 0x221   :  { %957 = vst [vmem:[#allocation9 + $0x20] sm:$0xff] %v925_v0  ;;  %v1225_v1 = vpop.f32.mrb[6].mxu1 }
 0x222   :  { %v928_v2 = vadd.f32 %v1225_v1, %v1698_v52  ;;  %v686_v3 = vpop.f32.mrb[7].mxu1 }
 0x223   :  { %v927_v4 = vadd.f32 %v1698_v52, %v686_v3 }
 0x224   :  { %960 = vst [vmem:[#allocation9 + $0x38] sm:$0xff] %v928_v2 }
 0x225   :  { %959 = vst [vmem:[#allocation9 + $0x30] sm:$0xff] %v927_v4  ;;  %v1228_v5 = vpop.f32.mrb[8].mxu1 }
 0x226   :  { %v930_v6 = vadd.f32 %v1228_v5, %v1698_v52  ;;  %v696_v8 = vpop.f32.mrb[9].mxu1 }
 0x227   :  { %v929_v9 = vadd.f32 %v1698_v52, %v696_v8 }
 0x228   :  { %962 = vst [vmem:[#allocation9 + $0x48] sm:$0xff] %v930_v6 }
 0x229   :  { %961 = vst [vmem:[#allocation9 + $0x40] sm:$0xff] %v929_v9  ;;  %v1231_v7 = vpop.f32.mrb[10].mxu1 }
 0x22a   :  { %v932_v10 = vadd.f32 %v1231_v7, %v1698_v52  ;;  %v706_v12 = vpop.f32.mrb[11].mxu1 }
 0x22b   :  { %v931_v13 = vadd.f32 %v1698_v52, %v706_v12 }
 0x22c   :  { %964 = vst [vmem:[#allocation9 + $0x58] sm:$0xff] %v932_v10 }
 0x22d   :  { %963 = vst [vmem:[#allocation9 + $0x50] sm:$0xff] %v931_v13  ;;  %v1234_v14 = vpop.f32.mrb[12].mxu1 }
 0x22e   :  { %v934_v61 = vadd.f32 %v1234_v14, %v1698_v52  ;;  %v716_v15 = vpop.f32.mrb[13].mxu1 }
 0x22f   :  { %v933_v17 = vadd.f32 %v1698_v52, %v716_v15 }
 0x230   :  { %966 = vst [vmem:[#allocation9 + $0x68] sm:$0xff] %v934_v61 }
 0x231   :  { %965 = vst [vmem:[#allocation9 + $0x60] sm:$0xff] %v933_v17  ;;  %v1237_v18 = vpop.f32.mrb[14].mxu1 }
 0x232   :  { %v936_v19 = vadd.f32 %v1237_v18, %v1698_v52  ;;  %v726_v20 = vpop.f32.mrb[15].mxu1 }
 0x233   :  { %v935_v21 = vadd.f32 %v1698_v52, %v726_v20 }
 0x234   :  { %968 = vst [vmem:[#allocation9 + $0x78] sm:$0xff] %v936_v19 }
 0x235   :  { %967 = vst [vmem:[#allocation9 + $0x70] sm:$0xff] %v935_v21  ;;  %v1240_v23 = vpop.f32.mrb[16].mxu1 }
 0x236   :  { %v938_v24 = vadd.f32 %v1240_v23, %v1698_v52  ;;  %v736_v22 = vpop.f32.mrb[17].mxu1 }
 0x237   :  { %v937_v25 = vadd.f32 %v1698_v52, %v736_v22 }
 0x238   :  { %970 = vst [vmem:[#allocation9 + $0x88] sm:$0xff] %v938_v24 }
 0x239   :  { %969 = vst [vmem:[#allocation9 + $0x80] sm:$0xff] %v937_v25  ;;  %v1243_v27 = vpop.f32.mrb[18].mxu1 }
 0x23a   :  { %v940_v11 = vadd.f32 %v1243_v27, %v1698_v52  ;;  %v746_v28 = vpop.f32.mrb[19].mxu1 }
 0x23b   :  { %v939_v16 = vadd.f32 %v1698_v52, %v746_v28 }
 0x23c   :  { %972 = vst [vmem:[#allocation9 + $0x98] sm:$0xff] %v940_v11 }
 0x23d   :  { %971 = vst [vmem:[#allocation9 + $0x90] sm:$0xff] %v939_v16  ;;  %v1246_v29 = vpop.f32.mrb[20].mxu1 }
 0x23e   :  { %v942_v30 = vadd.f32 %v1246_v29, %v1698_v52  ;;  %v756_v31 = vpop.f32.mrb[21].mxu1 }
 0x23f   :  { %v941_v32 = vadd.f32 %v1698_v52, %v756_v31 }
 0x240   :  { %974 = vst [vmem:[#allocation9 + $0xa8] sm:$0xff] %v942_v30 }
 0x241   :  { %973 = vst [vmem:[#allocation9 + $0xa0] sm:$0xff] %v941_v32  ;;  %v1249_v33 = vpop.f32.mrb[22].mxu1 }
 0x242   :  { %v944_v34 = vadd.f32 %v1249_v33, %v1698_v52  ;;  %v766_v35 = vpop.f32.mrb[23].mxu1 }
 0x243   :  { %v943_v37 = vadd.f32 %v1698_v52, %v766_v35 }
 0x244   :  { %976 = vst [vmem:[#allocation9 + $0xb8] sm:$0xff] %v944_v34 }
 0x245   :  { %975 = vst [vmem:[#allocation9 + $0xb0] sm:$0xff] %v943_v37  ;;  %v1252_v38 = vpop.f32.mrb[24].mxu1 }
 0x246   :  { %v946_v39 = vadd.f32 %v1252_v38, %v1698_v52  ;;  %v776_v40 = vpop.f32.mrb[25].mxu1 }
 0x247   :  { %v945_v26 = vadd.f32 %v1698_v52, %v776_v40 }
 0x248   :  { %978 = vst [vmem:[#allocation9 + $0xc8] sm:$0xff] %v946_v39 }
 0x249   :  { %977 = vst [vmem:[#allocation9 + $0xc0] sm:$0xff] %v945_v26  ;;  %v1255_v41 = vpop.f32.mrb[26].mxu1 }
 0x24a   :  { %v948_v42 = vadd.f32 %v1255_v41, %v1698_v52  ;;  %v786_v43 = vpop.f32.mrb[27].mxu1 }
 0x24b   :  { %v947_v44 = vadd.f32 %v1698_v52, %v786_v43 }
 0x24c   :  { %980 = vst [vmem:[#allocation9 + $0xd8] sm:$0xff] %v948_v42 }
 0x24d   :  { %979 = vst [vmem:[#allocation9 + $0xd0] sm:$0xff] %v947_v44  ;;  %v1258_v46 = vpop.f32.mrb[28].mxu1 }
 0x24e   :  { %v950_v47 = vadd.f32 %v1258_v46, %v1698_v52  ;;  %v796_v48 = vpop.f32.mrb[29].mxu1 }
 0x24f   :  { %v949_v49 = vadd.f32 %v1698_v52, %v796_v48 }
 0x250   :  { %982 = vst [vmem:[#allocation9 + $0xe8] sm:$0xff] %v950_v47 }
 0x251   :  { %981 = vst [vmem:[#allocation9 + $0xe0] sm:$0xff] %v949_v49  ;;  %v1261_v36 = vpop.f32.mrb[30].mxu1 }
 0x252   :  { %v952_v50 = vadd.f32 %v1261_v36, %v1698_v52  ;;  %v806_v51 = vpop.f32.mrb[31].mxu1 }
 0x253   :  { %v951_v53 = vadd.f32 %v1698_v52, %v806_v51 }
 0x254   :  { %984 = vst [vmem:[#allocation9 + $0xf8] sm:$0xff] %v952_v50 }
 0x255   :  { %983 = vst [vmem:[#allocation9 + $0xf0] sm:$0xff] %v951_v53 }
 0x256   :  { %1473 = shalt.err (!%p1470_p0)
}
 0x257   :  { %s1474_s12 = scalar_lea.hbm %s1752_s5, 4096 }
 0x258   :  { %p1475_p1 = scmp.ne.s32.totalorder %s1752_s5, %s1474_s12  ;;  %p1478_p2 = scmp.lt.u32.totalorder %s1474_s12, %s1752_s5 }
 0x25a   :  { %p1480_p3 = pnand %p1478_p2, %p1475_p1 }
 0x25c   :  { %1483 = shalt.err (!%p1480_p3)
}
 0x25d   :  { %996 = dma.vmem_to_hbm [thread:$0]  %s991_s8, 4096, %s1752_s5, [#allocation5], %s1492_s30, %s1492_s30, %s1493_s6  }
 0x25e   :  { %1488 = dma.done.wait [#allocation5], 4096  }
 0x25f   :  { %1489 = vsyncadd [#allocation5], 4294963200 }
 0x260   :  { %1000 = vsyncpa [#allocation4], 1 }
 0x261   :  { %1001 = vsyncpa [#allocation7], 1 }
 0x262   :  { %1002 = vsyncpa [#allocation5], 1 }

</bundles_post_ra>
